<compile_context>
chip_gen: v6e
topology: v6e:2x2x1
jax: 0.10.0
libtpu: 0.0.40
codegen_flags: <defaults>
</compile_context>

<pallas_src>
import functools

import jax
import jax.numpy as jnp
import numpy as np
from jax.experimental import pallas as pl
from jax.experimental.pallas import tpu as pltpu

_LANES = 128                     # vreg lane width
_SUBLANES = 8                    # f32 sublanes per vreg
_HORNER_MAX_DEGREE = 8           # power basis is well-conditioned in f32 up to here
_VMEM_LIMIT_BYTES = 40 * 1024 * 1024
_STATIC_ARGS = ("degree", "x_min", "y_min", "x_max", "y_max",
                "tile_rows", "min_tile_rows")


def _legendre_monomial_matrix(degree):
    """M[i, k] = coefficient of x^k in P_i(x), built once at trace time (f64)."""
    m = np.zeros((degree + 1, degree + 1), dtype=np.float64)
    m[0, 0] = 1.0
    if degree >= 1:
        m[1, 1] = 1.0
    for n in range(1, degree):
        # P_{n+1} = ((2n+1) x P_n - n P_{n-1}) / (n+1)
        m[n + 1, 1:] += (2.0 * n + 1.0) / (n + 1.0) * m[n, :-1]
        m[n + 1, :] -= n / (n + 1.0) * m[n - 1, :]
    return m


def _compute_s(xy_ref, x_min, y_min, scale):
    # xy_ref: (2, tile_rows, 128) packed x/y slab.
    dx = xy_ref[0] - x_min
    dy = xy_ref[1] - y_min
    # s' = 2 * ((dx^2 + dy^2) / denom) - 1 ; 2/denom folded into `scale`.
    return jnp.clip((dx * dx + dy * dy) * scale - 1.0, -1.0, 1.0)


def _make_horner_kernel(degree, x_min, y_min, scale):
    """Monomial/Horner evaluation: c_ref holds monomial coefficients in SMEM."""
    def kernel(c_ref, xy_ref, out_ref):
        s = _compute_s(xy_ref, x_min, y_min, scale)
        if degree == 0:
            out_ref[...] = jnp.zeros_like(s) + c_ref[0]
            return
        acc = c_ref[degree] * s + c_ref[degree - 1]
        for k in range(degree - 2, -1, -1):      # static unroll
            acc = acc * s + c_ref[k]
        out_ref[...] = acc
    return kernel


def _make_bonnet_kernel(degree, x_min, y_min, scale):
    """Bonnet recursion fallback (high degree); w_ref holds Legendre weights."""
    # Bonnet coefficients as compile-time Python floats (no runtime divides).
    a = [(2.0 * k + 1.0) / (k + 1.0) for k in range(degree)]
    b = [float(k) / (k + 1.0) for k in range(degree)]

    def kernel(w_ref, xy_ref, out_ref):
        s = _compute_s(xy_ref, x_min, y_min, scale)
        p_nm1 = jnp.ones_like(s)                 # P_0
        out = w_ref[0] * p_nm1
        if degree >= 1:
            p_n = s                              # P_1
            out = out + w_ref[1] * p_n
            for k in range(1, degree):           # static unroll
                p_np1 = a[k] * s * p_n - b[k] * p_nm1
                p_nm1, p_n = p_n, p_np1
                out = out + w_ref[k + 1] * p_n
        out_ref[...] = out
    return kernel


def _legendre_radial_bias(xy, weights, *, degree, x_min, y_min, x_max, y_max,
                          tile_rows, min_tile_rows):
    """xy: (2, N) f32 SoA coordinates. Returns bias (N,) f32."""
    n = xy.shape[1]
    denom = (float(x_max) - float(x_min)) ** 2 + (float(y_max) - float(y_min)) ** 2
    scale = 2.0 / denom

    # --- static tile geometry -------------------------------------------------
    rows = max(pl.cdiv(n, _LANES), 1)
    rows8 = pl.cdiv(rows, _SUBLANES) * _SUBLANES
    tr_req = max(pl.cdiv(int(tile_rows), _SUBLANES) * _SUBLANES, _SUBLANES)
    tr_min = max(pl.cdiv(int(min_tile_rows), _SUBLANES) * _SUBLANES, _SUBLANES)
    tr = min(max(tr_req, tr_min), rows8)          # clamp tiny tiles, cap at data size
    rows_padded = pl.cdiv(rows8, tr) * tr
    n_padded = rows_padded * _LANES

    # --- lane-dense packed slab (fused into surrounding XLA under jit) --------
    xy = xy.astype(jnp.float32)
    xy_slab = jnp.pad(xy, ((0, 0), (0, n_padded - n))).reshape(
        2, rows_padded, _LANES)

    # --- choose evaluation scheme (static on degree) ---------------------------
    if degree <= _HORNER_MAX_DEGREE:
        m = _legendre_monomial_matrix(degree)
        # Tiny (d+1)x(d+1) matvec on the (runtime, learnable) weights.
        scalars = jnp.asarray(m.T, dtype=jnp.float32) @ weights.astype(jnp.float32)
        kernel = _make_horner_kernel(degree, float(x_min), float(y_min), scale)
    else:
        scalars = weights.astype(jnp.float32)
        kernel = _make_bonnet_kernel(degree, float(x_min), float(y_min), scale)

    out2d = pl.pallas_call(
        kernel,
        out_shape=jax.ShapeDtypeStruct((rows_padded, _LANES), jnp.float32),
        grid_spec=pltpu.PrefetchScalarGridSpec(
            num_scalar_prefetch=0,
            grid=(rows_padded // tr,),
            in_specs=[
                pl.BlockSpec(memory_space=pltpu.SMEM),              # coefficients
                pl.BlockSpec((2, tr, _LANES), lambda i: (0, i, 0)),  # packed x/y
            ],
            out_specs=pl.BlockSpec((tr, _LANES), lambda i: (i, 0)),
        ),
        compiler_params=pltpu.CompilerParams(
            dimension_semantics=("parallel",),       # megacore-shardable (v7x)
            vmem_limit_bytes=_VMEM_LIMIT_BYTES),
    )(scalars, xy_slab)

    return out2d.reshape(-1)[:n]


@functools.partial(jax.jit, static_argnames=_STATIC_ARGS)
def legendre_basis_2d_radial_cv(positions, weights, *, degree, x_min, y_min,
                                x_max, y_max, tile_rows=8192, min_tile_rows=256):
    """positions: (N, 3); weights: (degree+1,). Returns bias (N,) f32."""
    # Only x/y columns are read; slice+transpose+pad fuse under jit so the z
    # column and the relayout never add a separate un-fused HBM pass.
    positions = positions.astype(jnp.float32)
    xy = positions[:, :2].T                          # (2, N) SoA
    return _legendre_radial_bias(
        xy, weights, degree=degree, x_min=x_min, y_min=y_min,
        x_max=x_max, y_max=y_max, tile_rows=tile_rows,
        min_tile_rows=min_tile_rows)


@functools.partial(jax.jit, static_argnames=_STATIC_ARGS)
def legendre_basis_2d_radial_cv_xy(x, y, weights, *, degree, x_min, y_min,
                                   x_max, y_max, tile_rows=8192,
                                   min_tile_rows=256):
    """SoA entry point: x, y: (N,) coordinates; weights: (degree+1,)."""
    xy = jnp.stack([x.astype(jnp.float32), y.astype(jnp.float32)])
    return _legendre_radial_bias(
        xy, weights, degree=degree, x_min=x_min, y_min=y_min,
        x_max=x_max, y_max=y_max, tile_rows=tile_rows,
        min_tile_rows=min_tile_rows)


def _reference(positions, weights, degree, x_min, y_min, x_max, y_max):
    x = positions[:, 0]
    y = positions[:, 1]
    s = ((x - x_min) ** 2 + (y - y_min) ** 2) / (
        (x_max - x_min) ** 2 + (y_max - y_min) ** 2)
    s = (s - 0.5) / 0.5
    s = jnp.clip(s, -1.0, 1.0)
    p_nm1 = jnp.ones_like(s)
    out = weights[0] * p_nm1
    if degree >= 1:
        p_n = s
        out = out + weights[1] * p_n
        for n in range(1, degree):
            p_np1 = ((2 * n + 1) * s * p_n - n * p_nm1) / (n + 1)
            p_nm1 = p_n
            p_n = p_np1
            out = out + weights[n + 1] * p_n
    return out


if __name__ == "__main__":
    x_min, y_min, x_max, y_max = 0.0, 0.0, 1.0, 1.0

    key = jax.random.PRNGKey(0)
    k_pos, k_w, k_pos2, k_w2 = jax.random.split(key, 4)

    # Case 1: tiny shape consistent with the module (N particles x 3 dims),
    # default (production) tiling, Horner path (degree 4).
    degree = 4
    weights = jax.random.uniform(k_w, (degree + 1,), dtype=jnp.float32)
    n_particles = 16
    positions = jax.random.uniform(k_pos, (n_particles, 3),
                                   dtype=jnp.float32, minval=-0.2, maxval=1.2)
    bias = legendre_basis_2d_radial_cv(
        positions, weights, degree=degree,
        x_min=x_min, y_min=y_min, x_max=x_max, y_max=y_max)
    bias = jax.block_until_ready(bias)
    ref = _reference(positions, weights, degree, x_min, y_min, x_max, y_max)
    assert bias.shape == (n_particles,)
    assert jnp.allclose(bias, ref, atol=1e-5, rtol=1e-5)

    # Case 2: multi-tile grid + padding path (small tile forced explicitly;
    # production callers get the min_tile_rows=256 clamp).
    n2 = 2000
    positions2 = jax.random.uniform(k_pos2, (n2, 3),
                                    dtype=jnp.float32, minval=-0.2, maxval=1.2)
    bias2 = legendre_basis_2d_radial_cv(
        positions2, weights, degree=degree,
        x_min=x_min, y_min=y_min, x_max=x_max, y_max=y_max,
        tile_rows=8, min_tile_rows=8)
    bias2 = jax.block_until_ready(bias2)
    ref2 = _reference(positions2, weights, degree, x_min, y_min, x_max, y_max)
    assert bias2.shape == (n2,)
    assert jnp.allclose(bias2, ref2, atol=1e-5, rtol=1e-5)

    # Case 3: high degree exercises the Bonnet fallback kernel + SoA entry.
    degree3 = 9
    weights3 = jax.random.uniform(k_w2, (degree3 + 1,), dtype=jnp.float32)
    bias3 = legendre_basis_2d_radial_cv_xy(
        positions2[:, 0], positions2[:, 1], weights3, degree=degree3,
        x_min=x_min, y_min=y_min, x_max=x_max, y_max=y_max)
    bias3 = jax.block_until_ready(bias3)
    ref3 = _reference(positions2, weights3, degree3, x_min, y_min, x_max, y_max)
    assert bias3.shape == (n2,)
    assert jnp.allclose(bias3, ref3, atol=1e-5, rtol=1e-5)

    print("KERNEL_OK")
</pallas_src>

<mosaic_0001>
module attributes {stable_mosaic.version = 11 : i64} {
  func.func @kernel(%arg0: i32, %arg1: memref<5xf32, #tpu.memory_space<smem>>, %arg2: memref<2x8x128xf32, #tpu.memory_space<vmem>>, %arg3: memref<8x128xf32, #tpu.memory_space<vmem>>) attributes {dimension_semantics = [#tpu.dimension_semantics<parallel>], iteration_bounds = array<i64: 1>, scalar_prefetch = 0 : i64, scratch_operands = 0 : i64, tpu.core_type = #tpu.core_type<tc>, window_params = [{transform_indices = @transform_0, window_bounds = array<i64: 5>}, {transform_indices = @transform_1, window_bounds = array<i64: 2, 8, 128>}, {transform_indices = @transform_2, window_bounds = array<i64: 8, 128>}]} {
    %c0 = arith.constant 0 : index
    %c0_0 = arith.constant 0 : index
    %c0_1 = arith.constant 0 : index
    %0 = vector.load %arg2[%c0, %c0_0, %c0_1] : memref<2x8x128xf32, #tpu.memory_space<vmem>>, vector<1x8x128xf32>
    %1 = vector.shape_cast %0 : vector<1x8x128xf32> to vector<8x128xf32>
    %cst = arith.constant 0.000000e+00 : f32
    %2 = vector.broadcast %cst : f32 to vector<8x128xf32>
    %3 = arith.subf %1, %2 : vector<8x128xf32>
    %c1 = arith.constant 1 : index
    %c0_2 = arith.constant 0 : index
    %c0_3 = arith.constant 0 : index
    %4 = vector.load %arg2[%c1, %c0_2, %c0_3] : memref<2x8x128xf32, #tpu.memory_space<vmem>>, vector<1x8x128xf32>
    %5 = vector.shape_cast %4 : vector<1x8x128xf32> to vector<8x128xf32>
    %cst_4 = arith.constant 0.000000e+00 : f32
    %6 = vector.broadcast %cst_4 : f32 to vector<8x128xf32>
    %7 = arith.subf %5, %6 : vector<8x128xf32>
    %8 = arith.mulf %3, %3 : vector<8x128xf32>
    %9 = arith.mulf %7, %7 : vector<8x128xf32>
    %10 = arith.addf %8, %9 : vector<8x128xf32>
    %cst_5 = arith.constant 1.000000e+00 : f32
    %11 = vector.broadcast %cst_5 : f32 to vector<8x128xf32>
    %12 = arith.mulf %10, %11 : vector<8x128xf32>
    %cst_6 = arith.constant 1.000000e+00 : f32
    %13 = vector.broadcast %cst_6 : f32 to vector<8x128xf32>
    %14 = arith.subf %12, %13 : vector<8x128xf32>
    %cst_7 = arith.constant -1.000000e+00 : f32
    %cst_8 = arith.constant 1.000000e+00 : f32
    %15 = vector.broadcast %cst_7 : f32 to vector<8x128xf32>
    %16 = arith.maximumf %15, %14 : vector<8x128xf32>
    %17 = vector.broadcast %cst_8 : f32 to vector<8x128xf32>
    %18 = arith.minimumf %17, %16 : vector<8x128xf32>
    %c4 = arith.constant 4 : index
    %19 = memref.load %arg1[%c4] : memref<5xf32, #tpu.memory_space<smem>>
    %20 = vector.broadcast %19 : f32 to vector<8x128xf32>
    %21 = arith.mulf %20, %18 : vector<8x128xf32>
    %c3 = arith.constant 3 : index
    %22 = memref.load %arg1[%c3] : memref<5xf32, #tpu.memory_space<smem>>
    %23 = vector.broadcast %22 : f32 to vector<8x128xf32>
    %24 = arith.addf %21, %23 : vector<8x128xf32>
    %25 = arith.mulf %24, %18 : vector<8x128xf32>
    %c2 = arith.constant 2 : index
    %26 = memref.load %arg1[%c2] : memref<5xf32, #tpu.memory_space<smem>>
    %27 = vector.broadcast %26 : f32 to vector<8x128xf32>
    %28 = arith.addf %25, %27 : vector<8x128xf32>
    %29 = arith.mulf %28, %18 : vector<8x128xf32>
    %c1_9 = arith.constant 1 : index
    %30 = memref.load %arg1[%c1_9] : memref<5xf32, #tpu.memory_space<smem>>
    %31 = vector.broadcast %30 : f32 to vector<8x128xf32>
    %32 = arith.addf %29, %31 : vector<8x128xf32>
    %33 = arith.mulf %32, %18 : vector<8x128xf32>
    %c0_10 = arith.constant 0 : index
    %34 = memref.load %arg1[%c0_10] : memref<5xf32, #tpu.memory_space<smem>>
    %35 = vector.broadcast %34 : f32 to vector<8x128xf32>
    %36 = arith.addf %33, %35 : vector<8x128xf32>
    %c0_11 = arith.constant 0 : index
    %c0_12 = arith.constant 0 : index
    %37 = vector.load %arg3[%c0_11, %c0_12] : memref<8x128xf32, #tpu.memory_space<vmem>>, vector<8x128xf32>
    tpu.vector_store %arg3[%c0_11, %c0_12], %36 {strides = array<i32>} : memref<8x128xf32, #tpu.memory_space<vmem>>, vector<8x128xf32>,
    return
  }
  func.func @transform_0(%arg0: i32) -> i32 {
    %c0_i32 = arith.constant 0 : i32
    %c0_i32_0 = arith.constant 0 : i32
    return %c0_i32 : i32
  }
  func.func @transform_1(%arg0: i32) -> (i32, i32, i32) {
    %c0_i32 = arith.constant 0 : i32
    %c0_i32_0 = arith.constant 0 : i32
    %c0_i32_1 = arith.constant 0 : i32
    return %c0_i32, %arg0, %c0_i32_0 : i32, i32, i32
  }
  func.func @transform_2(%arg0: i32) -> (i32, i32) {
    %c0_i32 = arith.constant 0 : i32
    %c0_i32_0 = arith.constant 0 : i32
    return %arg0, %c0_i32 : i32, i32
  }
}

</mosaic_0001>

<bundles_post_ra>
// kernel: legendre_basis_2d_radial_cv.1
= control target key start
LH: loop header
LB: loop body
LE: loop exit
PB: predicated region body
PF: predicated region fallthrough
CT: control target
= control target key end

     0   :  { %7 = vsyncpa [#allocation3], 0  ;;  %s107_s0 = inlined_call_operand.vmem [shape: f32[5], index: 0, kind: input, shape index: {}]   ;;  %s108_s1 = inlined_call_operand.vmem [shape: f32[2,8,128], index: 1, kind: input, shape index: {}]   ;;  %s109_s2 = inlined_call_operand.vmem [shape: f32[8,128], index: 2, kind: output, shape index: {}]  }
   0x1   :  { %s14_s11 = sshll.u32 %s107_s0, 4  ;;  %s15_s11 = int_to_ptr.vmem [resolvable:$true] %s14_s11 }
   0x2   :  { %s65_s12 = scalar_lea.vmem %s15_s11, 16  ;;  %p70_p1 = scmp.lt.s32.totalorder %s15_s11, %s15_s11 }
   0x3   :  { %p66_p0 = scmp.ne.s32.totalorder %s15_s11, %s65_s12  ;;  %p71_p2 = scmp.lt.s32.totalorder %s65_s12, %s65_s12 }
   0x5   :  { %p72_p3 = por %p71_p2, %p70_p1 }
   0x7   :  { %p73_p4 = pnand %p72_p3, %p66_p0 }
   0x9   :  { %76 = shalt.err (!%p73_p4)
}
   0xa   :  { %s79_s13 = smov [#allocation2]  }
   0xb   :  { %17 = dma.vmem_to_smem %s15_s11, 16, %s79_s13, [#allocation3]  }
   0xc   :  { %77 = dma.done.wait [#allocation3], 16  }
   0xd   :  { %78 = vsyncadd [#allocation3], 4294967280 }
   0xe   :  { %23 = sfence }
   0xf   :  { %v24_v0 = vld [vmem:[%s108_s1] sm:$0xff]  ;;  %v57_v1 = vld [vmem:[%s108_s1 + $0x8] sm:$0xff]  ;;  %s60_s0 = sld [smem:[#allocation2 + $0x4]] }
  0x10   :  { %v27_v2 = vmul.f32 %v24_v0, %v24_v0  ;;  %v28_v3 = vmul.f32 %v57_v1, %v57_v1  ;;  %s61_s18 = sld [smem:[#allocation2 + $0x3]] }
  0x11   :  { %s62_s19 = sld [smem:[#allocation2 + $0x2]] }
  0x12   :  { %v29_v4 = vadd.f32 %v28_v3, %v27_v2  ;;  %s63_s20 = sld [smem:[#allocation2 + $0x1]] }
  0x13   :  { %s48_s21 = sld [smem:[#allocation2]] }
  0x14   :  { %v58_v5 = vadd.f32 -1.0, %v29_v4 }
  0x15   :  { %v34_v6 = vstv %s60_s0 }
  0x16   :  { %v59_v7 = vclamps-f32 %v58_v5, 1.0  ;;  %v37_v8 = vstv %s61_s18 }
  0x17   :  { %v41_v11 = vstv %s62_s19 }
  0x18   :  { %v35_v9 = vmul.f32 %v59_v7, %v34_v6  ;;  %v45_v14 = vstv %s63_s20 }
  0x19   :  { %v49_v17 = vstv %s48_s21 }
  0x1a   :  { %v38_v10 = vadd.f32 %v37_v8, %v35_v9 }
  0x1c   :  { %v39_v12 = vmul.f32 %v59_v7, %v38_v10 }
  0x1e   :  { %v42_v13 = vadd.f32 %v41_v11, %v39_v12 }
  0x20   :  { %v43_v15 = vmul.f32 %v59_v7, %v42_v13 }
  0x22   :  { %v46_v16 = vadd.f32 %v45_v14, %v43_v15 }
  0x24   :  { %v47_v18 = vmul.f32 %v59_v7, %v46_v16 }
  0x26   :  { %v50_v19 = vadd.f32 %v49_v17, %v47_v18 }
  0x28   :  { %51 = vst [vmem:[%s109_s2] sm:$0xff] %v50_v19 }
  0x29   :  { %56 = vsyncpa [#allocation3], 1 }

</bundles_post_ra>
